<compile_context>
chip_gen: v6e
topology: v6e:2x2x1
jax: 0.10.0
libtpu: 0.0.40
codegen_flags: <defaults>
</compile_context>

<pallas_src>
import functools
import math

import jax
import jax.numpy as jnp
from jax.experimental import pallas as pl
from jax.experimental.pallas import tpu as pltpu

BN_EPS = 1e-5
LANE = 128
SUBLANE = 8


def _round_up(v, m):
    return ((v + m - 1) // m) * m


# ---------------------------------------------------------------------------
# Fused kernel: one grid step == one GIN layer (conv -> relu -> batchnorm -> pool)
# ---------------------------------------------------------------------------
def fused_ginv_kernel(eps_ref, nreal_ref, invn_ref,
                      adj_ref, x_ref, pool_ref,
                      w_ref, b_ref, gamma_ref, beta_ref,
                      z_out_ref, g_out_ref,
                      z_scr):
    layer = pl.program_id(0)

    @pl.when(layer == 0)
    def _():
        z_scr[...] = x_ref[...]                     # load input features once

    eps = eps_ref[layer]
    n_real = nreal_ref[0]
    inv_n = invn_ref[0]

    z = z_scr[...]                                  # (Np, Dp) f32, resident across layers

    # GIN aggregation: (A + I) @ z  (MXU, bf16 operands, f32 accumulation)
    agg = jnp.dot(adj_ref[...], z.astype(jnp.bfloat16),
                  preferred_element_type=jnp.float32)
    h = agg + eps * z                               # learnable self-loop weight

    # Linear (prune_flag=False -> plain linear), MXU bf16 path
    h = jnp.dot(h.astype(jnp.bfloat16), w_ref[0],
                preferred_element_type=jnp.float32) + b_ref[0]

    # ReLU
    h = jnp.maximum(h, 0.0)

    # Mask padded node rows out of the BatchNorm statistics
    row_ids = jax.lax.broadcasted_iota(jnp.int32, h.shape, 0)
    h = jnp.where(row_ids < n_real, h, 0.0)

    # BatchNorm1d, training-mode stats (biased variance), single reduction pass
    mean = jnp.sum(h, axis=0, keepdims=True) * inv_n
    var = jnp.sum(h * h, axis=0, keepdims=True) * inv_n - mean * mean
    var = jnp.maximum(var, 0.0)
    z_new = (h - mean) * jax.lax.rsqrt(var + BN_EPS)
    z_new = z_new * gamma_ref[0] + beta_ref[0]

    z_scr[...] = z_new                              # stays resident for the next layer
    z_out_ref[0] = z_new

    # global_add_pool: pool[g, n] = 1 iff batch[n] == g (zero columns for padded nodes)
    g_out_ref[0] = jnp.dot(pool_ref[...], z_new.astype(jnp.bfloat16),
                           preferred_element_type=jnp.float32)


# ---------------------------------------------------------------------------
# Wrapper: one pallas_call for the whole encoder
# ---------------------------------------------------------------------------
def ginv_forward(params, x, edge_index, batch, *, num_graphs, hidden_dim, num_layers):
    n, fin = x.shape
    dp = params["w"].shape[-1]                      # padded feature width (multiple of 128)
    n_p = _round_up(n, LANE)                        # node dim padded (lane dim of adj/pool)
    g_p = _round_up(num_graphs, SUBLANE)

    # Dense adjacency adj[i, j] = #edges j -> i with the GIN self term folded in (A + I).
    # TODO(synk): for large sparse graphs, replace the dense O(N^2) adjacency with
    # CSR / scalar-prefetch gather aggregation and a node-tiled grid.
    src, tgt = edge_index[0], edge_index[1]
    adj = jnp.zeros((n_p, n_p), jnp.float32)
    adj = adj.at[tgt, src].add(1.0)
    diag = jnp.arange(n)
    adj = adj.at[diag, diag].add(1.0)
    adj = adj.astype(jnp.bfloat16)                  # small integer counts: exact in bf16

    # Pooling matrix (0/1 entries: exact in bf16); padded node columns stay zero.
    pool = jnp.zeros((g_p, n_p), jnp.float32).at[batch, jnp.arange(n)].set(1.0)
    pool = pool.astype(jnp.bfloat16)

    # Zero-padded node features
    x_p = jnp.zeros((n_p, dp), jnp.float32).at[:n, :fin].set(x.astype(jnp.float32))

    nreal = jnp.array([n], jnp.int32)
    invn = jnp.array([1.0 / n], jnp.float32)

    flops = num_layers * (2 * n_p * n_p * dp + 2 * n_p * dp * dp + 2 * g_p * n_p * dp)
    bytes_accessed = (n_p * n_p * 2 + n_p * dp * 4 + g_p * n_p * 2
                      + num_layers * (dp * dp * 2 + 3 * dp * 4
                                      + n_p * dp * 4 + g_p * dp * 4))

    grid_spec = pltpu.PrefetchScalarGridSpec(
        num_scalar_prefetch=0,
        grid=(num_layers,),
        in_specs=[
            pl.BlockSpec(memory_space=pltpu.SMEM),              # eps (L,)
            pl.BlockSpec(memory_space=pltpu.SMEM),              # n_real (1,)
            pl.BlockSpec(memory_space=pltpu.SMEM),              # 1/n_real (1,)
            pl.BlockSpec((n_p, n_p), lambda l: (0, 0)),         # adjacency (DMA'd once)
            pl.BlockSpec((n_p, dp), lambda l: (0, 0)),          # x0 (DMA'd once)
            pl.BlockSpec((g_p, n_p), lambda l: (0, 0)),         # pooling matrix (once)
            pl.BlockSpec((1, dp, dp), lambda l: (l, 0, 0)),     # per-layer W^T (pipelined)
            pl.BlockSpec((1, 1, dp), lambda l: (l, 0, 0)),      # per-layer bias
            pl.BlockSpec((1, 1, dp), lambda l: (l, 0, 0)),      # per-layer BN gamma
            pl.BlockSpec((1, 1, dp), lambda l: (l, 0, 0)),      # per-layer BN beta
        ],
        out_specs=[
            pl.BlockSpec((1, n_p, dp), lambda l: (l, 0, 0)),    # per-layer node features
            pl.BlockSpec((1, g_p, dp), lambda l: (l, 0, 0)),    # per-layer graph features
        ],
        scratch_shapes=[pltpu.VMEM((n_p, dp), jnp.float32)],    # resident z across layers
    )

    z_out, g_out = pl.pallas_call(
        fused_ginv_kernel,
        out_shape=(jax.ShapeDtypeStruct((num_layers, n_p, dp), jnp.float32),
                   jax.ShapeDtypeStruct((num_layers, g_p, dp), jnp.float32)),
        grid_spec=grid_spec,
        compiler_params=pltpu.CompilerParams(
            dimension_semantics=("arbitrary",),     # layers are sequential (z carried in VMEM)
            vmem_limit_bytes=64 * 1024 * 1024,
        ),
        cost_estimate=pl.CostEstimate(flops=flops,
                                      transcendentals=num_layers * dp,
                                      bytes_accessed=bytes_accessed),
    )(params["eps"], nreal, invn, adj, x_p, pool,
      params["w"], params["b"], params["gamma"], params["beta"])

    z_cat = jnp.concatenate([z_out[l, :n, :hidden_dim] for l in range(num_layers)], axis=1)
    g_cat = jnp.concatenate([g_out[l, :num_graphs, :hidden_dim] for l in range(num_layers)],
                            axis=1)
    return z_cat, g_cat


# ---------------------------------------------------------------------------
# Encoder_self_damaged.forward: three encoder passes
# ---------------------------------------------------------------------------
def encoder_self_damaged_forward(params, x, edge_index, batch, *,
                                 num_graphs, hidden_dim, num_layers):
    # TODO(synk): the augmentor pair (aug1, aug2) is external to this module; it is
    # treated as the identity augmentation here.
    fwd = functools.partial(ginv_forward, num_graphs=num_graphs,
                            hidden_dim=hidden_dim, num_layers=num_layers)
    z, g = fwd(params, x, edge_index, batch)
    z1, g1 = fwd(params, x, edge_index, batch)
    # TODO(synk): prune_flag=True requires prune_linear popup-score masks (external
    # module state); the prune_flag=False (plain linear) path is used for all passes.
    z2, g2 = fwd(params, x, edge_index, batch)
    return z, g, z1, z2, g1, g2


# ---------------------------------------------------------------------------
# Parameters: pre-transposed / pre-padded / pre-cast once (not per forward call)
# ---------------------------------------------------------------------------
def init_params(key, input_dim, hidden_dim, num_layers):
    dp = _round_up(max(input_dim, hidden_dim), LANE)
    w_stack, b_stack, g_stack, be_stack = [], [], [], []
    for i in range(num_layers):
        din = input_dim if i == 0 else hidden_dim
        key, kw, kb = jax.random.split(key, 3)
        bound = 1.0 / math.sqrt(float(din))
        w = jax.random.uniform(kw, (hidden_dim, din), jnp.float32, -bound, bound)
        b = jax.random.uniform(kb, (hidden_dim,), jnp.float32, -bound, bound)
        w_stack.append(jnp.zeros((dp, dp), jnp.float32).at[:din, :hidden_dim].set(w.T))
        b_stack.append(jnp.zeros((1, dp), jnp.float32).at[0, :hidden_dim].set(b))
        g_stack.append(jnp.zeros((1, dp), jnp.float32).at[0, :hidden_dim].set(1.0))
        be_stack.append(jnp.zeros((1, dp), jnp.float32))
    # TODO(synk): self.project (2-layer MLP) is constructed but never used in
    # GINV.forward, so it is not implemented here.
    return {
        "w": jnp.stack(w_stack).astype(jnp.bfloat16),   # (L, Dp, Dp)  W^T, padded, bf16
        "b": jnp.stack(b_stack),                        # (L, 1, Dp)
        "gamma": jnp.stack(g_stack),                    # (L, 1, Dp)
        "beta": jnp.stack(be_stack),                    # (L, 1, Dp)
        "eps": jnp.zeros((num_layers,), jnp.float32),   # GINConv train_eps init = 0
    }


if __name__ == "__main__":
    key = jax.random.PRNGKey(0)

    num_nodes = 16
    input_dim = 8
    hidden_dim = 32
    num_layers = 2
    num_edges = 40
    num_graphs = 2

    k_x, k_src, k_tgt, k_p = jax.random.split(key, 4)
    x = jax.random.normal(k_x, (num_nodes, input_dim), jnp.float32)
    edge_index = jnp.stack([
        jax.random.randint(k_src, (num_edges,), 0, num_nodes),
        jax.random.randint(k_tgt, (num_edges,), 0, num_nodes),
    ], axis=0)
    batch = jnp.concatenate([
        jnp.zeros((num_nodes // 2,), jnp.int32),
        jnp.ones((num_nodes - num_nodes // 2,), jnp.int32),
    ])

    params = init_params(k_p, input_dim, hidden_dim, num_layers)

    fwd = jax.jit(functools.partial(
        encoder_self_damaged_forward,
        num_graphs=num_graphs, hidden_dim=hidden_dim, num_layers=num_layers))
    z, g, z1, z2, g1, g2 = fwd(params, x, edge_index, batch)
    jax.block_until_ready((z, g, z1, z2, g1, g2))

    assert z.shape == (num_nodes, hidden_dim * num_layers)
    assert g.shape == (num_graphs, hidden_dim * num_layers)
    assert z1.shape == z.shape and z2.shape == z.shape
    assert g1.shape == g.shape and g2.shape == g.shape
    print("KERNEL_OK")
</pallas_src>

<mosaic_0001>
module attributes {stable_mosaic.version = 11 : i64} {
  func.func private @main(%arg0: i32) attributes {dimension_semantics = [#tpu.dimension_semantics<core_parallel>], iteration_bounds = array<i64: 2>, tpu.core_type = #tpu.core_type<sc_scalar_subcore>, window_params = []} {
    return
  }
}

module attributes {stable_mosaic.version = 11 : i64} {
  func.func private @main(%arg0: i32) attributes {dimension_semantics = [#tpu.dimension_semantics<core_parallel>], iteration_bounds = array<i64: 2>, tpu.core_type = #tpu.core_type<sc_scalar_subcore>, window_params = []} {
    return
  }
}

module attributes {stable_mosaic.version = 11 : i64} {
  func.func @fused_ginv_kernel(%arg0: i32, %arg1: memref<2xf32, #tpu.memory_space<smem>>, %arg2: memref<1xi32, #tpu.memory_space<smem>>, %arg3: memref<1xf32, #tpu.memory_space<smem>>, %arg4: memref<128x128xbf16, #tpu.memory_space<vmem>>, %arg5: memref<128x128xf32, #tpu.memory_space<vmem>>, %arg6: memref<8x128xbf16, #tpu.memory_space<vmem>>, %arg7: memref<1x128x128xbf16, #tpu.memory_space<vmem>>, %arg8: memref<1x1x128xf32, #tpu.memory_space<vmem>>, %arg9: memref<1x1x128xf32, #tpu.memory_space<vmem>>, %arg10: memref<1x1x128xf32, #tpu.memory_space<vmem>>, %arg11: memref<1x128x128xf32, #tpu.memory_space<vmem>>, %arg12: memref<1x8x128xf32, #tpu.memory_space<vmem>>, %arg13: memref<128x128xf32, #tpu.memory_space<vmem>>) attributes {dimension_semantics = [#tpu.dimension_semantics<arbitrary>], iteration_bounds = array<i64: 2>, scalar_prefetch = 0 : i64, scratch_operands = 1 : i64, tpu.core_type = #tpu.core_type<tc>, window_params = [{transform_indices = @transform_0, window_bounds = array<i64: 2>}, {transform_indices = @transform_1, window_bounds = array<i64: 1>}, {transform_indices = @transform_2, window_bounds = array<i64: 1>}, {pipeline_mode = #tpu.pipeline_mode<synchronous>, transform_indices = @transform_3, window_bounds = array<i64: 128, 128>}, {pipeline_mode = #tpu.pipeline_mode<synchronous>, transform_indices = @transform_4, window_bounds = array<i64: 128, 128>}, {pipeline_mode = #tpu.pipeline_mode<synchronous>, transform_indices = @transform_5, window_bounds = array<i64: 8, 128>}, {transform_indices = @transform_6, window_bounds = array<i64: 1, 128, 128>}, {transform_indices = @transform_7, window_bounds = array<i64: 1, 1, 128>}, {transform_indices = @transform_8, window_bounds = array<i64: 1, 1, 128>}, {transform_indices = @transform_9, window_bounds = array<i64: 1, 1, 128>}, {transform_indices = @transform_10, window_bounds = array<i64: 1, 128, 128>}, {transform_indices = @transform_11, window_bounds = array<i64: 1, 8, 128>}]} {
    %c0_i32 = arith.constant 0 : i32
    %0 = arith.cmpi eq, %arg0, %c0_i32 : i32
    %1 = arith.extui %0 : i1 to i32
    %c0_i32_0 = arith.constant 0 : i32
    %2 = arith.cmpi ne, %1, %c0_i32_0 : i32
    scf.if %2 {
      %c0_36 = arith.constant 0 : index
      %c0_37 = arith.constant 0 : index
      %67 = vector.load %arg5[%c0_36, %c0_37] : memref<128x128xf32, #tpu.memory_space<vmem>>, vector<128x128xf32>
      %c0_38 = arith.constant 0 : index
      %c0_39 = arith.constant 0 : index
      %68 = vector.load %arg13[%c0_38, %c0_39] : memref<128x128xf32, #tpu.memory_space<vmem>>, vector<128x128xf32>
      tpu.vector_store %arg13[%c0_38, %c0_39], %67 {strides = array<i32>} : memref<128x128xf32, #tpu.memory_space<vmem>>, vector<128x128xf32>,
    } else {
    }
    %3 = arith.index_cast %arg0 : i32 to index
    %4 = memref.load %arg1[%3] : memref<2xf32, #tpu.memory_space<smem>>
    %c0 = arith.constant 0 : index
    %5 = memref.load %arg2[%c0] : memref<1xi32, #tpu.memory_space<smem>>
    %c0_1 = arith.constant 0 : index
    %6 = memref.load %arg3[%c0_1] : memref<1xf32, #tpu.memory_space<smem>>
    %c0_2 = arith.constant 0 : index
    %c0_3 = arith.constant 0 : index
    %7 = vector.load %arg13[%c0_2, %c0_3] : memref<128x128xf32, #tpu.memory_space<vmem>>, vector<128x128xf32>
    %c0_4 = arith.constant 0 : index
    %c0_5 = arith.constant 0 : index
    %8 = vector.load %arg4[%c0_4, %c0_5] : memref<128x128xbf16, #tpu.memory_space<vmem>>, vector<128x128xbf16>
    %9 = arith.truncf %7 : vector<128x128xf32> to vector<128x128xbf16>
    %cst = arith.constant dense<0.000000e+00> : vector<128x128xf32>
    %10 = tpu.matmul %8, %9, %cst {dimension_numbers = #tpu.dot_dimension_numbers<[1], [0], [0], [1], [0, 0, 1, 1], [], []>} : vector<128x128xbf16>, vector<128x128xbf16>, vector<128x128xf32> -> vector<128x128xf32>
    %11 = vector.broadcast %4 : f32 to vector<128x128xf32>
    %12 = arith.mulf %11, %7 : vector<128x128xf32>
    %13 = arith.addf %10, %12 : vector<128x128xf32>
    %14 = arith.truncf %13 : vector<128x128xf32> to vector<128x128xbf16>
    %c0_6 = arith.constant 0 : index
    %c0_7 = arith.constant 0 : index
    %c0_8 = arith.constant 0 : index
    %15 = vector.load %arg7[%c0_6, %c0_7, %c0_8] : memref<1x128x128xbf16, #tpu.memory_space<vmem>>, vector<1x128x128xbf16>
    %16 = vector.shape_cast %15 : vector<1x128x128xbf16> to vector<128x128xbf16>
    %cst_9 = arith.constant dense<0.000000e+00> : vector<128x128xf32>
    %17 = tpu.matmul %14, %16, %cst_9 {dimension_numbers = #tpu.dot_dimension_numbers<[1], [0], [0], [1], [0, 0, 1, 1], [], []>} : vector<128x128xbf16>, vector<128x128xbf16>, vector<128x128xf32> -> vector<128x128xf32>
    %c0_10 = arith.constant 0 : index
    %c0_11 = arith.constant 0 : index
    %c0_12 = arith.constant 0 : index
    %18 = vector.load %arg8[%c0_10, %c0_11, %c0_12] : memref<1x1x128xf32, #tpu.memory_space<vmem>>, vector<1x1x128xf32>
    %19 = vector.shape_cast %18 : vector<1x1x128xf32> to vector<1x128xf32>
    %20 = vector.broadcast %19 : vector<1x128xf32> to vector<128x128xf32>
    %21 = arith.addf %17, %20 : vector<128x128xf32>
    %cst_13 = arith.constant 0.000000e+00 : f32
    %22 = vector.broadcast %cst_13 : f32 to vector<128x128xf32>
    %23 = arith.maximumf %21, %22 : vector<128x128xf32>
    %24 = tpu.iota {dimensions = array<i32: 0>} : vector<128x128xi32>
    %25 = vector.broadcast %5 : i32 to vector<128x128xi32>
    %26 = arith.cmpi slt, %24, %25 : vector<128x128xi32>
    %cst_14 = arith.constant 0.000000e+00 : f32
    %27 = vector.broadcast %cst_14 : f32 to vector<128x128xf32>
    %28 = arith.select %26, %23, %27 : vector<128x128xi1>, vector<128x128xf32>
    %cst_15 = arith.constant dense<0.000000e+00> : vector<128xf32>
    %29 = vector.multi_reduction <add>, %28, %cst_15 [0] : vector<128x128xf32> to vector<128xf32>
    %30 = vector.shape_cast %29 : vector<128xf32> to vector<1x128xf32>
    %31 = vector.broadcast %6 : f32 to vector<1x128xf32>
    %32 = arith.mulf %30, %31 : vector<1x128xf32>
    %33 = arith.mulf %28, %28 : vector<128x128xf32>
    %cst_16 = arith.constant dense<0.000000e+00> : vector<128xf32>
    %34 = vector.multi_reduction <add>, %33, %cst_16 [0] : vector<128x128xf32> to vector<128xf32>
    %35 = vector.shape_cast %34 : vector<128xf32> to vector<1x128xf32>
    %36 = vector.broadcast %6 : f32 to vector<1x128xf32>
    %37 = arith.mulf %35, %36 : vector<1x128xf32>
    %38 = arith.mulf %32, %32 : vector<1x128xf32>
    %39 = arith.subf %37, %38 : vector<1x128xf32>
    %cst_17 = arith.constant 0.000000e+00 : f32
    %40 = vector.broadcast %cst_17 : f32 to vector<1x128xf32>
    %41 = arith.maximumf %39, %40 : vector<1x128xf32>
    %42 = vector.broadcast %32 : vector<1x128xf32> to vector<128x128xf32>
    %43 = arith.subf %28, %42 : vector<128x128xf32>
    %cst_18 = arith.constant 9.99999974E-6 : f32
    %44 = vector.broadcast %cst_18 : f32 to vector<1x128xf32>
    %45 = arith.addf %41, %44 : vector<1x128xf32>
    %46 = math.rsqrt %45 : vector<1x128xf32>
    %47 = vector.broadcast %46 : vector<1x128xf32> to vector<128x128xf32>
    %48 = arith.mulf %43, %47 : vector<128x128xf32>
    %c0_19 = arith.constant 0 : index
    %c0_20 = arith.constant 0 : index
    %c0_21 = arith.constant 0 : index
    %49 = vector.load %arg9[%c0_19, %c0_20, %c0_21] : memref<1x1x128xf32, #tpu.memory_space<vmem>>, vector<1x1x128xf32>
    %50 = vector.shape_cast %49 : vector<1x1x128xf32> to vector<1x128xf32>
    %51 = vector.broadcast %50 : vector<1x128xf32> to vector<128x128xf32>
    %52 = arith.mulf %48, %51 : vector<128x128xf32>
    %c0_22 = arith.constant 0 : index
    %c0_23 = arith.constant 0 : index
    %c0_24 = arith.constant 0 : index
    %53 = vector.load %arg10[%c0_22, %c0_23, %c0_24] : memref<1x1x128xf32, #tpu.memory_space<vmem>>, vector<1x1x128xf32>
    %54 = vector.shape_cast %53 : vector<1x1x128xf32> to vector<1x128xf32>
    %55 = vector.broadcast %54 : vector<1x128xf32> to vector<128x128xf32>
    %56 = arith.addf %52, %55 : vector<128x128xf32>
    %c0_25 = arith.constant 0 : index
    %c0_26 = arith.constant 0 : index
    %57 = vector.load %arg13[%c0_25, %c0_26] : memref<128x128xf32, #tpu.memory_space<vmem>>, vector<128x128xf32>
    tpu.vector_store %arg13[%c0_25, %c0_26], %56 {strides = array<i32>} : memref<128x128xf32, #tpu.memory_space<vmem>>, vector<128x128xf32>,
    %c0_27 = arith.constant 0 : index
    %c0_28 = arith.constant 0 : index
    %c0_29 = arith.constant 0 : index
    %58 = vector.load %arg11[%c0_27, %c0_28, %c0_29] : memref<1x128x128xf32, #tpu.memory_space<vmem>>, vector<1x128x128xf32>
    %59 = vector.shape_cast %58 : vector<1x128x128xf32> to vector<128x128xf32>
    %60 = vector.shape_cast %56 : vector<128x128xf32> to vector<1x128x128xf32>
    tpu.vector_store %arg11[%c0_27, %c0_28, %c0_29], %60 {strides = array<i32>} : memref<1x128x128xf32, #tpu.memory_space<vmem>>, vector<1x128x128xf32>,
    %c0_30 = arith.constant 0 : index
    %c0_31 = arith.constant 0 : index
    %61 = vector.load %arg6[%c0_30, %c0_31] : memref<8x128xbf16, #tpu.memory_space<vmem>>, vector<8x128xbf16>
    %62 = arith.truncf %56 : vector<128x128xf32> to vector<128x128xbf16>
    %cst_32 = arith.constant dense<0.000000e+00> : vector<8x128xf32>
    %63 = tpu.matmul %61, %62, %cst_32 {dimension_numbers = #tpu.dot_dimension_numbers<[1], [0], [0], [1], [0, 0, 1, 1], [], []>} : vector<8x128xbf16>, vector<128x128xbf16>, vector<8x128xf32> -> vector<8x128xf32>
    %c0_33 = arith.constant 0 : index
    %c0_34 = arith.constant 0 : index
    %c0_35 = arith.constant 0 : index
    %64 = vector.load %arg12[%c0_33, %c0_34, %c0_35] : memref<1x8x128xf32, #tpu.memory_space<vmem>>, vector<1x8x128xf32>
    %65 = vector.shape_cast %64 : vector<1x8x128xf32> to vector<8x128xf32>
    %66 = vector.shape_cast %63 : vector<8x128xf32> to vector<1x8x128xf32>
    tpu.vector_store %arg12[%c0_33, %c0_34, %c0_35], %66 {strides = array<i32>} : memref<1x8x128xf32, #tpu.memory_space<vmem>>, vector<1x8x128xf32>,
    return
  }
  func.func @transform_0(%arg0: i32) -> i32 {
    %c0_i32 = arith.constant 0 : i32
    %c0_i32_0 = arith.constant 0 : i32
    return %c0_i32 : i32
  }
  func.func @transform_1(%arg0: i32) -> i32 {
    %c0_i32 = arith.constant 0 : i32
    %c0_i32_0 = arith.constant 0 : i32
    return %c0_i32 : i32
  }
  func.func @transform_2(%arg0: i32) -> i32 {
    %c0_i32 = arith.constant 0 : i32
    %c0_i32_0 = arith.constant 0 : i32
    return %c0_i32 : i32
  }
  func.func @transform_3(%arg0: i32) -> (i32, i32) {
    %c0_i32 = arith.constant 0 : i32
    %c0_i32_0 = arith.constant 0 : i32
    %c0_i32_1 = arith.constant 0 : i32
    return %c0_i32, %c0_i32_0 : i32, i32
  }
  func.func @transform_4(%arg0: i32) -> (i32, i32) {
    %c0_i32 = arith.constant 0 : i32
    %c0_i32_0 = arith.constant 0 : i32
    %c0_i32_1 = arith.constant 0 : i32
    return %c0_i32, %c0_i32_0 : i32, i32
  }
  func.func @transform_5(%arg0: i32) -> (i32, i32) {
    %c0_i32 = arith.constant 0 : i32
    %c0_i32_0 = arith.constant 0 : i32
    %c0_i32_1 = arith.constant 0 : i32
    return %c0_i32, %c0_i32_0 : i32, i32
  }
  func.func @transform_6(%arg0: i32) -> (i32, i32, i32) {
    %c0_i32 = arith.constant 0 : i32
    %c0_i32_0 = arith.constant 0 : i32
    %c0_i32_1 = arith.constant 0 : i32
    return %arg0, %c0_i32, %c0_i32_0 : i32, i32, i32
  }
  func.func @transform_7(%arg0: i32) -> (i32, i32, i32) {
    %c0_i32 = arith.constant 0 : i32
    %c0_i32_0 = arith.constant 0 : i32
    %c0_i32_1 = arith.constant 0 : i32
    return %arg0, %c0_i32, %c0_i32_0 : i32, i32, i32
  }
  func.func @transform_8(%arg0: i32) -> (i32, i32, i32) {
    %c0_i32 = arith.constant 0 : i32
    %c0_i32_0 = arith.constant 0 : i32
    %c0_i32_1 = arith.constant 0 : i32
    return %arg0, %c0_i32, %c0_i32_0 : i32, i32, i32
  }
  func.func @transform_9(%arg0: i32) -> (i32, i32, i32) {
    %c0_i32 = arith.constant 0 : i32
    %c0_i32_0 = arith.constant 0 : i32
    %c0_i32_1 = arith.constant 0 : i32
    return %arg0, %c0_i32, %c0_i32_0 : i32, i32, i32
  }
  func.func @transform_10(%arg0: i32) -> (i32, i32, i32) {
    %c0_i32 = arith.constant 0 : i32
    %c0_i32_0 = arith.constant 0 : i32
    %c0_i32_1 = arith.constant 0 : i32
    return %arg0, %c0_i32, %c0_i32_0 : i32, i32, i32
  }
  func.func @transform_11(%arg0: i32) -> (i32, i32, i32) {
    %c0_i32 = arith.constant 0 : i32
    %c0_i32_0 = arith.constant 0 : i32
    %c0_i32_1 = arith.constant 0 : i32
    return %arg0, %c0_i32, %c0_i32_0 : i32, i32, i32
  }
}

</mosaic_0001>

<bundles_post_ra>
// kernel: encoder_self_damaged_forward.3
= control target key start
LH: loop header
LB: loop body
LE: loop exit
PB: predicated region body
PF: predicated region fallthrough
CT: control target
= control target key end

     0   :  { %s2068_s0 = inlined_call_operand.vmem [shape: f32[2], index: 0, kind: input, shape index: {}]   ;;  %s2069_s1 = inlined_call_operand.<no memory space> [shape: s32[1], index: 1, kind: input, shape index: {}]   ;;  %s2070_s2 = inlined_call_operand.<no memory space> [shape: f32[1], index: 2, kind: input, shape index: {}]   ;;  %s2071_s3 = inlined_call_operand.vmem [shape: bf16[128,128], index: 3, kind: input, shape index: {}]   ;;  %s2072_s4 = inlined_call_operand.vmem [shape: f32[128,128], index: 4, kind: input, shape index: {}]   ;;  %s2073_s5 = inlined_call_operand.vmem [shape: bf16[8,128], index: 5, kind: input, shape index: {}]   ;;  %s2074_s6 = inlined_call_operand.vmem [shape: bf16[2,128,128], index: 6, kind: input, shape index: {}]   ;;  %s2075_s7 = inlined_call_operand.vmem [shape: f32[2,1,128], index: 7, kind: input, shape index: {}]   ;;  %s2076_s8 = inlined_call_operand.vmem [shape: f32[2,1,128], index: 8, kind: input, shape index: {}]   ;;  %s2077_s9 = inlined_call_operand.vmem [shape: f32[2,1,128], index: 9, kind: input, shape index: {}]   ;;  %s2078_s10 = inlined_call_operand.vmem [shape: f32[2,128,128], index: 10, kind: output, shape index: {0}]   ;;  %s2079_s11 = inlined_call_operand.vmem [shape: f32[2,8,128], index: 11, kind: output, shape index: {1}]  }
   0x1   :  { %17 = sst [smem:[#allocation3]] %s2069_s1 }
   0x2   :  { %18 = sst [smem:[#allocation4]] %s2070_s2 }
   0x3   :  { %19 = vsyncpa [#allocation6], 0  ;;  %s1587_s21 = smov 0  }
   0x4 LB: > { %s1593_s22 = sadd.s32 4294967295, %s1516_s21   ;;  %p1293_p0 = scmp.ge.s32.totalorder %s1516_s21, 1  ;;  %s1516_s21 = sphi %s1587_s21, %s25_s21  }
   0x5   : > { %p312_p1 = scmp.lt.s32.totalorder %s1516_s21, 3  ;;  %s325_s23 = sshll.u32 %s2068_s0, 4  ;;  %s326_s23 = int_to_ptr.vmem [resolvable:$true] %s325_s23 }
   0x6   : > { %p1460_p4 = scmp.eq.s32.totalorder %s1593_s22, 0  ;;  %s1491_s25 = scalar_lea.vmem %s326_s23, 16 }
   0x7   : > { %p1601_p3 = pnand %p1293_p0, %p312_p1  ;;  %p1492_p7 = scmp.ne.s32.totalorder %s326_s23, %s1491_s25 }
   0x8   : > { %p1499_p11 = scmp.lt.s32.totalorder %s326_s23, %s326_s23  ;;  %p1500_p12 = scmp.lt.s32.totalorder %s1491_s25, %s1491_s25 }
   0x9   : > { %p1456_p5 = pneg %p1601_p3 }
   0xa   : > { %p1501_p13 = por %p1500_p12, %p1499_p11 }
   0xb   : > { %p1457_p6 = pnand %p1460_p4, %p1456_p5 }
   0xd   : > { %p1493_p8 = pneg %p1457_p6 }
   0xf   : > { %p1494_p9 = pnand %p1493_p8, %p1492_p7 }
  0x11   : > { %p1495_p10 = pneg %p1494_p9 }
  0x13   : > { %p1502_p2 = pnand %p1501_p13, %p1495_p10 }
  0x15   : > { %1505 = shalt.err (!%p1502_p2)
}
  0x16   : > { %s1518_s26 = smov [#allocation5]   ;;  %379 = sbr.rel (%p1601_p3) target bundleno = 805 (0x325), region = 60 }
  0x17   : > { %1459 = dma.vmem_to_smem (!%p1457_p6), %s326_s23, 16, %s1518_s26, [#allocation6]  }
  0x1b   : > { %1511 = dma.done.wait (%p1460_p4), [#allocation6], 16  }
  0x1c   : > { %1513 = vsyncadd (%p1460_p4), [#allocation6], 4294967280 }
  0x1d   : > { %385 = sfence }
  0x1e   : > { %p433_p0 = scmp.lt.s32.totalorder %s1593_s22, 1  ;;  %p2081_p1 = scmp.ne.s32.totalorder %s1593_s22, 0 }
  0x20   : > { %s1618_s27 = scalar_select %p433_p0, %s1593_s22, 1 }
  0x22   : > { %s1325_s28 = sshll.u32 %s1618_s27, 6  ;;  %s440_s12 = scalar_lea.vmem %s2075_s7, %s1618_s27 }
  0x23   : > { %s1628_s15 = scalar_lea.vmem %s2074_s6, %s1325_s28  ;;  %s443_s18 = scalar_lea.vmem %s2076_s8, %s1618_s27 }
  0x24   : > { %s446_s1 = scalar_lea.vmem %s2077_s9, %s1618_s27  ;;  %s1326_s2 = sshll.u32 %s1618_s27, 7 }
  0x25   : > { %s1642_s25 = scalar_lea.vmem %s2078_s10, %s1326_s2  ;;  %s1302_s26 = sshll.u32 %s1618_s27, 3 }
  0x26   : > { %s1648_s28 = scalar_lea.vmem %s2079_s11, %s1302_s26  ;;  %460 = sbr.rel (%p2081_p1) target bundleno = 52 (0x34), region = 68 }
  0x2b   : > { %v461_v0 = vld [vmem:[%s2072_s4] sm:$0xff]  ;;  %v462_v1 = vld [vmem:[%s2072_s4 + $0x8] sm:$0xff]  ;;  %v463_v2 = vld [vmem:[%s2072_s4 + $0x10] sm:$0xff] }
  0x2c   : > { %477 = vst [vmem:[#allocation2 + $0x30] sm:$0xff] %v461_v0  ;;  %478 = vst [vmem:[#allocation2] sm:$0xff] %v462_v1  ;;  %v464_v3 = vld [vmem:[%s2072_s4 + $0x18] sm:$0xff]  ;;  %v465_v4 = vld [vmem:[%s2072_s4 + $0x20] sm:$0xff] }
  0x2d   : > { %479 = vst [vmem:[#allocation2 + $0x58] sm:$0xff] %v463_v2  ;;  %v466_v5 = vld [vmem:[%s2072_s4 + $0x28] sm:$0xff]  ;;  %480 = vst [vmem:[#allocation2 + $0x18] sm:$0xff] %v464_v3  ;;  %v467_v6 = vld [vmem:[%s2072_s4 + $0x30] sm:$0xff] }
  0x2e   : > { %481 = vst [vmem:[#allocation2 + $0x50] sm:$0xff] %v465_v4  ;;  %482 = vst [vmem:[#allocation2 + $0x68] sm:$0xff] %v466_v5  ;;  %v468_v7 = vld [vmem:[%s2072_s4 + $0x38] sm:$0xff]  ;;  %v469_v8 = vld [vmem:[%s2072_s4 + $0x40] sm:$0xff] }
  0x2f   : > { %483 = vst [vmem:[#allocation2 + $0x8] sm:$0xff] %v467_v6  ;;  %484 = vst [vmem:[#allocation2 + $0x48] sm:$0xff] %v468_v7  ;;  %v470_v9 = vld [vmem:[%s2072_s4 + $0x48] sm:$0xff]  ;;  %v471_v10 = vld [vmem:[%s2072_s4 + $0x50] sm:$0xff] }
  0x30   : > { %485 = vst [vmem:[#allocation2 + $0x40] sm:$0xff] %v469_v8  ;;  %v472_v11 = vld [vmem:[%s2072_s4 + $0x58] sm:$0xff]  ;;  %486 = vst [vmem:[#allocation2 + $0x20] sm:$0xff] %v470_v9  ;;  %v473_v12 = vld [vmem:[%s2072_s4 + $0x60] sm:$0xff] }
  0x31   : > { %487 = vst [vmem:[#allocation2 + $0x10] sm:$0xff] %v471_v10  ;;  %488 = vst [vmem:[#allocation2 + $0x38] sm:$0xff] %v472_v11  ;;  %v474_v13 = vld [vmem:[%s2072_s4 + $0x68] sm:$0xff]  ;;  %v475_v14 = vld [vmem:[%s2072_s4 + $0x70] sm:$0xff] }
  0x32   : > { %489 = vst [vmem:[#allocation2 + $0x60] sm:$0xff] %v473_v12  ;;  %490 = vst [vmem:[#allocation2 + $0x70] sm:$0xff] %v474_v13  ;;  %v476_v15 = vld [vmem:[%s2072_s4 + $0x78] sm:$0xff] }
  0x33   : > { %491 = vst [vmem:[#allocation2 + $0x78] sm:$0xff] %v475_v14  ;;  %492 = vst [vmem:[#allocation2 + $0x28] sm:$0xff] %v476_v15 }
  0x34 PF: > { %v1473_v27 = vld [vmem:[%s2071_s3] sm:$0xff]   ;;  %v1481_v34 = vld [vmem:[%s1628_s15 + $0x38] sm:$0xff]   ;;  %v1482_v35 = vld [vmem:[%s1628_s15 + $0x30] sm:$0xff]   ;;  %s493_s13 = sld [smem:[#allocation5 + %s1593_s22]]  ;;  %vm1520_vm0 = vmmov 0  }
  0x35   : > { %1384 = vmatprep.mubr.bf16.mxu0 %v1473_v27  ;;  %v1731_v31 = vld [vmem:[#allocation2 + $0x50] sm:$0xff]  ;;  %v1735_v33 = vld [vmem:[#allocation2 + $0x68] sm:$0xff]  ;;  %v498_v36 = vld [vmem:[#allocation2 + $0x58] sm:$0xff]  ;;  %1400 = vmatprep.subr.bf16.mxu1 %v1481_v34  ;;  %s494_s22 = sld [smem:[#allocation3]] }
  0x36   : > { %v1727_v29 = vld [vmem:[#allocation2 + $0x8] sm:$0xff]  ;;  %v530_v37 = vpack.c.bf16 %v1735_v33, %v1731_v31  ;;  %v499_v38 = vld [vmem:[#allocation2 + $0x18] sm:$0xff]  ;;  %1401 = vmatpush3.bf16.msra.mxu1 %v1481_v34  ;;  %v496_v41 = vld [vmem:[#allocation2 + $0x30] sm:$0xff] }
  0x37   : > { %v1716_v24 = vld [vmem:[#allocation2 + $0x40] sm:$0xff]  ;;  %v1729_v30 = vld [vmem:[#allocation2 + $0x48] sm:$0xff]  ;;  %1402 = vmatprep.subr.bf16.mxu1 %v1482_v35  ;;  %v529_v40 = vpack.c.bf16 %v499_v38, %v498_v36  ;;  %v1485_v45 = vld [vmem:[%s1628_s15 + $0x18] sm:$0xff]  }
  0x38   : > { %v1712_v22 = vld [vmem:[#allocation2 + $0x10] sm:$0xff]  ;;  %v1714_v23 = vld [vmem:[#allocation2 + $0x38] sm:$0xff]  ;;  %v1720_v26 = vld [vmem:[#allocation2 + $0x20] sm:$0xff]  ;;  %v531_v32 = vpack.c.bf16 %v1729_v30, %v1727_v29 }
  0x39   : > { %v1704_v18 = vld [vmem:[#allocation2 + $0x60] sm:$0xff]  ;;  %v1708_v20 = vld [vmem:[#allocation2 + $0x70] sm:$0xff]  ;;  %v533_v25 = vpack.c.bf16 %v1714_v23, %v1712_v22  ;;  %v532_v28 = vpack.c.bf16 %v1720_v26, %v1716_v24  ;;  %v1483_v39 = vld [vmem:[%s1628_s15 + $0x28] sm:$0xff]  }
  0x3a   : > { %v1700_v16 = vld [vmem:[#allocation2 + $0x78] sm:$0xff]  ;;  %v1702_v17 = vld [vmem:[#allocation2 + $0x28] sm:$0xff]  ;;  %v534_v21 = vpack.c.bf16 %v1708_v20, %v1704_v18  ;;  %1403 = vmatpush3.bf16.msra.mxu1 %v1482_v35  ;;  %v497_v42 = vld [vmem:[#allocation2] sm:$0xff]  ;;  %v536_v57 = vstv %s493_s13 }
  0x3b   : > { %v535_v19 = vpack.c.bf16 %v1702_v17, %v1700_v16  ;;  %1404 = vmatprep.subr.bf16.mxu1 %v1483_v39  ;;  %v1484_v43 = vld [vmem:[%s1628_s15 + $0x20] sm:$0xff]   ;;  %v528_v44 = vpack.c.bf16 %v497_v42, %v496_v41  ;;  %v1474_v46 = vld [vmem:[%s2071_s3 + $0x8] sm:$0xff]   ;;  %v1475_v47 = vld [vmem:[%s2071_s3 + $0x10] sm:$0xff]   ;;  %v540_v59 = vmul.f32 %v536_v57, %v499_v38  ;;  %v537_v60 = vmul.f32 %v536_v57, %v496_v41 }
  0x3c   : > { %v1476_v48 = vld [vmem:[%s2071_s3 + $0x18] sm:$0xff]   ;;  %v1477_v49 = vld [vmem:[%s2071_s3 + $0x20] sm:$0xff]   ;;  %v1478_v50 = vld [vmem:[%s2071_s3 + $0x28] sm:$0xff]   ;;  %v538_v61 = vmul.f32 %v536_v57, %v497_v42  ;;  %v539_v62 = vmul.f32 %v536_v57, %v498_v36  ;;  %v544_v9 = vmul.f32 %v536_v57, %v1729_v30  ;;  %v541_v10 = vmul.f32 %v536_v57, %v1731_v31 }
  0x3d   : > { %1368 = vmatprep.subr.bf16.mxu0 %v535_v19  ;;  %v1479_v51 = vld [vmem:[%s2071_s3 + $0x30] sm:$0xff]   ;;  %v1480_v52 = vld [vmem:[%s2071_s3 + $0x38] sm:$0xff]   ;;  %v1487_v54 = vld [vmem:[%s1628_s15 + $0x8] sm:$0xff]   ;;  %v542_v11 = vmul.f32 %v536_v57, %v1735_v33  ;;  %v543_v12 = vmul.f32 %v536_v57, %v1727_v29  ;;  %v548_v30 = vmul.f32 %v536_v57, %v1714_v23  ;;  %v545_v31 = vmul.f32 %v536_v57, %v1716_v24 }
  0x3e   : > { %1369 = vmatpush3.bf16.msra.mxu0 %v535_v19  ;;  %1405 = vmatpush3.bf16.msra.mxu1 %v1483_v39  ;;  %v1486_v53 = vld [vmem:[%s1628_s15 + $0x10] sm:$0xff]   ;;  %v1488_v55 = vld [vmem:[%s1628_s15] sm:$0xff]   ;;  %v546_v33 = vmul.f32 %v536_v57, %v1720_v26  ;;  %v547_v29 = vmul.f32 %v536_v57, %v1712_v22  ;;  %v552_v23 = vmul.f32 %v536_v57, %v1702_v17  ;;  %v1519_v17 = vmov 0.0  }
  0x3f   : > { %1370 = vmatprep.subr.bf16.mxu0 %v534_v21  ;;  %1406 = vmatprep.subr.bf16.mxu1 %v1484_v43  ;;  %v549_v24 = vmul.f32 %v536_v57, %v1704_v18  ;;  %v550_v26 = vmul.f32 %v536_v57, %v1708_v20  ;;  %v551_v22 = vmul.f32 %v536_v57, %v1700_v16  ;;  %v890_v18 = vlaneseq  ;;  %v1788_v20 = vld [vmem:[%s440_s12] ss:$0 sm:$0xff]  ;;  %s495_s12 = sld [smem:[#allocation4]] }
  0x42   : > { %1371 = vmatpush3.bf16.msra.mxu0 %v534_v21  ;;  %1407 = vmatpush3.bf16.msra.mxu1 %v1484_v43 }
  0x43   : > { %1372 = vmatprep.subr.bf16.mxu0 %v533_v25  ;;  %1408 = vmatprep.subr.bf16.mxu1 %v1485_v45 }
  0x46   : > { %1373 = vmatpush3.bf16.msra.mxu0 %v533_v25  ;;  %1409 = vmatpush3.bf16.msra.mxu1 %v1485_v45 }
  0x47   : > { %1374 = vmatprep.subr.bf16.mxu0 %v532_v28  ;;  %1410 = vmatprep.subr.bf16.mxu1 %v1486_v53 }
  0x4a   : > { %1375 = vmatpush3.bf16.msra.mxu0 %v532_v28  ;;  %1411 = vmatpush3.bf16.msra.mxu1 %v1486_v53  ;;  %v1790_v53 = vshrl.u32 %v890_v18, 7 }
  0x4b   : > { %1376 = vmatprep.subr.bf16.mxu0 %v531_v32  ;;  %1412 = vmatprep.subr.bf16.mxu1 %v1487_v54 }
  0x4c   : > { %v893_v57 = vadd.s32 16, %v1790_v53 }
  0x4e   : > { %1377 = vmatpush3.bf16.msra.mxu0 %v531_v32  ;;  %1413 = vmatpush3.bf16.msra.mxu1 %v1487_v54 }
  0x4f   : > { %1378 = vmatprep.subr.bf16.mxu0 %v530_v37  ;;  %1414 = vmatprep.subr.bf16.mxu1 %v1488_v55 }
  0x52   : > { %1379 = vmatpush3.bf16.msra.mxu0 %v530_v37  ;;  %1415 = vmatpush3.bf16.msra.mxu1 %v1488_v55 }
  0x53   : > { %1380 = vmatprep.subr.bf16.mxu0 %v529_v40 }
  0x56   : > { %1381 = vmatpush3.bf16.msra.mxu0 %v529_v40 }
  0x57   : > { %1382 = vmatprep.subr.bf16.mxu0 %v528_v44 }
  0x5a   : > { %1383 = vmatpush3.bf16.msra.mxu0 %v528_v44 }
  0x5b   : > { %1432 = vmatprep.subr.bf16.mxu0 %v1519_v17 }
  0x5d   : > { %1385 = vmatmul.mubr.bf16.vlgmr.msra.gmra.mxu0 %v1474_v46 }
  0x5e   : > { %1388 = vmatprep.mubr.bf16.mxu0 %v1475_v47 }
  0x65   : > { %1389 = vmatmul.mubr.bf16.gmra.mxu0 %v1476_v48 }
  0x66   : > { %1392 = vmatprep.mubr.bf16.mxu0 %v1477_v49 }
  0x6d   : > { %1393 = vmatmul.mubr.bf16.gmra.mxu0 %v1478_v50 }
  0x6e   : > { %1396 = vmatprep.mubr.bf16.mxu0 %v1479_v51 }
  0x75   : > { %1397 = vmatmul.mubr.bf16.gmra.mxu0 %v1480_v52 }
  0x76   : > { %1448 = vmatprep.mubr.msk.bf16.mxu0 %vm1520_vm0, %v1519_v17 }
 0x11d   : > { %v1386_v56 = vpop.f32.mrf.mxu0 }
 0x11e   : > { %v644_v4 = vadd.f32 %v1386_v56, %v539_v62 }
 0x11f   : > { %v635_v58 = vpop.f32.mrf.mxu0 }
 0x120   : > { %v636_v2 = vadd.f32 %v635_v58, %v537_v60  ;;  %v1796_v60 = vstv %s494_s22 }
 0x121   : > { %v1387_v63 = vpop.f32.mrf.mxu0  ;;  %vm908_vm1 = vcmp.lt.s32.totalorder %v1790_v53, %v1796_v60  ;;  %vm910_vm2 = vcmp.lt.s32.totalorder %v893_v57, %v1796_v60  ;;  %v902_v57 = vadd.s32 88, %v1790_v53 }
 0x122   : > { %v647_v0 = vadd.f32 %v1387_v63, %v540_v59  ;;  %v892_v59 = vadd.s32 8, %v1790_v53  ;;  %v894_v63 = vadd.s32 24, %v1790_v53 }
 0x123   : > { %v638_v1 = vpop.f32.mrf.mxu0  ;;  %vm919_vm12 = vcmp.lt.s32.totalorder %v902_v57, %v1796_v60 }
 0x124   : > { %v639_v3 = vadd.f32 %v638_v1, %v538_v61  ;;  %v699_v7 = vpack.c.bf16 %v647_v0, %v644_v4  ;;  %v895_v1 = vadd.s32 32, %v1790_v53  ;;  %vm909_vm3 = vcmp.lt.s32.totalorder %v892_v59, %v1796_v60 }
 0x125   : > { %v1390_v5 = vpop.f32.mrf.mxu0  ;;  %vm911_vm4 = vcmp.lt.s32.totalorder %v894_v63, %v1796_v60  ;;  %v903_v63 = vadd.s32 96, %v1790_v53 }
 0x126   : > { %v698_v6 = vpack.c.bf16 %v639_v3, %v636_v2  ;;  %v660_v25 = vadd.f32 %v1390_v5, %v543_v12  ;;  %vm912_vm5 = vcmp.lt.s32.totalorder %v895_v1, %v1796_v60 }
 0x127   : > { %v651_v8 = vpop.f32.mrf.mxu0  ;;  %vm920_vm13 = vcmp.lt.s32.totalorder %v903_v63, %v1796_v60 }
 0x128   : > { %1416 = vmatprep.mubr.bf16.mxu1 %v698_v6  ;;  %v652_v19 = vadd.f32 %v651_v8, %v541_v10  ;;  %v897_v8 = vadd.s32 48, %v1790_v53 }
 0x129   : > { %v1391_v13 = vpop.f32.mrf.mxu0  ;;  %1417 = vmatmul.mubr.bf16.vlgmr.msra.gmra.mxu1 %v699_v7 }
 0x12a   : > { %v663_v14 = vadd.f32 %v1391_v13, %v544_v9  ;;  %vm914_vm6 = vcmp.lt.s32.totalorder %v897_v8, %v1796_v60 }
 0x12b   : > { %v654_v15 = vpop.f32.mrf.mxu0 }
 0x12c   : > { %v655_v21 = vadd.f32 %v654_v15, %v542_v11  ;;  %v701_v32 = vpack.c.bf16 %v663_v14, %v660_v25  ;;  %v896_v25 = vadd.s32 40, %v1790_v53 }
 0x12d   : > { %v1394_v27 = vpop.f32.mrf.mxu0 }
 0x12e   : > { %v700_v28 = vpack.c.bf16 %v655_v21, %v652_v19  ;;  %v676_v40 = vadd.f32 %v1394_v27, %v547_v29  ;;  %vm913_vm7 = vcmp.lt.s32.totalorder %v896_v25, %v1796_v60 }
 0x12f   : > { %v667_v34 = vpop.f32.mrf.mxu0 }
 0x130   : > { %1420 = vmatprep.mubr.bf16.mxu1 %v700_v28  ;;  %v668_v38 = vadd.f32 %v667_v34, %v545_v31  ;;  %v898_v34 = vadd.s32 56, %v1790_v53 }
 0x131   : > { %v1395_v35 = vpop.f32.mrf.mxu0  ;;  %1421 = vmatmul.mubr.bf16.gmra.mxu1 %v701_v32 }
 0x132   : > { %v679_v36 = vadd.f32 %v1395_v35, %v548_v30  ;;  %v899_v35 = vadd.s32 64, %v1790_v53  ;;  %vm915_vm8 = vcmp.lt.s32.totalorder %v898_v34, %v1796_v60 }
 0x133   : > { %v670_v37 = vpop.f32.mrf.mxu0 }
 0x134   : > { %v671_v39 = vadd.f32 %v670_v37, %v546_v33  ;;  %v703_v43 = vpack.c.bf16 %v679_v36, %v676_v40  ;;  %vm916_vm9 = vcmp.lt.s32.totalorder %v899_v35, %v1796_v60 }
 0x135   : > { %v1398_v41 = vpop.f32.mrf.mxu0 }
 0x136   : > { %v702_v42 = vpack.c.bf16 %v671_v39, %v668_v38  ;;  %v692_v50 = vadd.f32 %v1398_v41, %v551_v22 }
 0x137   : > { %v683_v44 = vpop.f32.mrf.mxu0 }
 0x138   : > { %1424 = vmatprep.mubr.bf16.mxu1 %v702_v42  ;;  %v684_v48 = vadd.f32 %v683_v44, %v549_v24 }
 0x139   : > { %v1399_v45 = vpop.f32.mrf.mxu0  ;;  %1425 = vmatmul.mubr.bf16.gmra.mxu1 %v703_v43 }
 0x13a   : > { %v695_v46 = vadd.f32 %v1399_v45, %v552_v23  ;;  %v901_v23 = vadd.s32 80, %v1790_v53 }
 0x13b   : > { %v686_v47 = vpop.f32.mrf.mxu0 }
 0x13c   : > { %v687_v49 = vadd.f32 %v686_v47, %v550_v26  ;;  %v705_v52 = vpack.c.bf16 %v695_v46, %v692_v50  ;;  %vm918_vm10 = vcmp.lt.s32.totalorder %v901_v23, %v1796_v60 }
 0x13e   : > { %v704_v51 = vpack.c.bf16 %v687_v49, %v684_v48 }
 0x140   : > { %1428 = vmatprep.mubr.bf16.mxu1 %v704_v51 }
 0x141   : > { %1429 = vmatmul.mubr.bf16.gmra.mxu1 %v705_v52 }
 0x1e9   : > { %v1418_v16 = vpop.f32.mrf.mxu1 }
 0x1ea   : > { %v820_v55 = vadd.f32 %v1418_v16, %v1788_v20  ;;  %v900_v16 = vadd.s32 72, %v1790_v53 }
 0x1eb   : > { %v811_v54 = vpop.f32.mrf.mxu1 }
 0x1ec   : > { %v812_v56 = vadd.f32 %v1788_v20, %v811_v54  ;;  %v876_v2 = vmax.f32 %v820_v55, 0.0  ;;  %vm917_vm11 = vcmp.lt.s32.totalorder %v900_v16, %v1796_v60 }
 0x1ed   : > { %v1419_v58 = vpop.f32.mrf.mxu1 }
 0x1ee   : > { %v874_v61 = vmax.f32 %v812_v56, 0.0  ;;  %v823_v62 = vadd.f32 %v1419_v58, %v1788_v20  ;;  %v1811_v10 = vsel %vm910_vm2, %v876_v2, 0.0 }
 0x1ef   : > { %v814_v0 = vpop.f32.mrf.mxu1  ;;  %v965_v30 = vmul.f32 %v1811_v10, %v1811_v10 }
 0x1f0   : > { %v815_v3 = vadd.f32 %v1788_v20, %v814_v0  ;;  %v1806_v5 = vsel %vm908_vm1, %v874_v61, 0.0  ;;  %v877_v6 = vmax.f32 %v823_v62, 0.0 }
 0x1f1   : > { %v1422_v4 = vpop.f32.mrf.mxu1  ;;  %v963_v14 = vmul.f32 %v1806_v5, %v1806_v5 }
 0x1f2   : > { %v875_v7 = vmax.f32 %v815_v3, 0.0  ;;  %v836_v12 = vadd.f32 %v1422_v4, %v1788_v20  ;;  %v1824_v27 = vsel %vm911_vm4, %v877_v6, 0.0 }
 0x1f3   : > { %v827_v9 = vpop.f32.mrf.mxu1  ;;  %v966_v39 = vmul.f32 %v1824_v27, %v1824_v27 }
 0x1f4   : > { %v1813_v11 = vsel %vm909_vm3, %v875_v7, 0.0  ;;  %v828_v13 = vadd.f32 %v1788_v20, %v827_v9  ;;  %v880_v36 = vmax.f32 %v836_v12, 0.0  ;;  %v905_v12 = vadd.s32 112, %v1790_v53 }
 0x1f5   : > { %v940_v15 = vadd.f32 %v1813_v11, %v1806_v5  ;;  %v964_v19 = vmul.f32 %v1813_v11, %v1813_v11  ;;  %v1423_v21 = vpop.f32.mrf.mxu1 }
 0x1f6   : > { %v878_v28 = vmax.f32 %v828_v13, 0.0  ;;  %v839_v32 = vadd.f32 %v1423_v21, %v1788_v20  ;;  %v1850_v46 = vsel %vm914_vm6, %v880_v36, 0.0  ;;  %vm922_vm14 = vcmp.lt.s32.totalorder %v905_v12, %v1796_v60 }
 0x1f7   : > { %v941_v31 = vadd.f32 %v940_v15, %v1811_v10  ;;  %v979_v33 = vadd.f32 %v964_v19, %v963_v14  ;;  %v830_v29 = vpop.f32.mrf.mxu1  ;;  %v969_v58 = vmul.f32 %v1850_v46, %v1850_v46 }
 0x1f8   : > { %v1835_v37 = vsel %vm912_vm5, %v878_v28, 0.0  ;;  %v831_v38 = vadd.f32 %v1788_v20, %v830_v29  ;;  %v881_v43 = vmax.f32 %v839_v32, 0.0  ;;  %v904_v29 = vadd.s32 104, %v1790_v53 }
 0x1f9   : > { %v980_v40 = vadd.f32 %v979_v33, %v965_v30  ;;  %v942_v41 = vadd.f32 %v941_v31, %v1824_v27  ;;  %v1426_v42 = vpop.f32.mrf.mxu1  ;;  %v967_v26 = vmul.f32 %v1835_v37, %v1835_v37 }
 0x1fa   : > { %v879_v44 = vmax.f32 %v831_v38, 0.0  ;;  %v852_v48 = vadd.f32 %v1426_v42, %v1788_v20  ;;  %v1862_v54 = vsel %vm915_vm8, %v881_v43, 0.0  ;;  %v906_v42 = vadd.s32 120, %v1790_v53 }
 0x1fb   : > { %v943_v24 = vadd.f32 %v942_v41, %v1835_v37  ;;  %v981_v22 = vadd.f32 %v980_v40, %v966_v39  ;;  %v843_v45 = vpop.f32.mrf.mxu1  ;;  %v970_v3 = vmul.f32 %v1862_v54, %v1862_v54  ;;  %vm921_vm15 = vcmp.lt.s32.totalorder %v904_v29, %v1796_v60 }
 0x1fc   : > { %v1852_v47 = vsel %vm913_vm7, %v879_v44, 0.0  ;;  %v844_v49 = vadd.f32 %v1788_v20, %v843_v45  ;;  %v884_v0 = vmax.f32 %v852_v48, 0.0  ;;  %vm923_vm0 = vcmp.lt.s32.totalorder %v906_v42, %v1796_v60 }
 0x1fd   : > { %v982_v50 = vadd.f32 %v981_v22, %v967_v26  ;;  %v944_v51 = vadd.f32 %v943_v24, %v1852_v47  ;;  %v968_v52 = vmul.f32 %v1852_v47, %v1852_v47  ;;  %v1427_v18 = vpop.f32.mrf.mxu1 }
 0x1fe   : > { %v882_v55 = vmax.f32 %v844_v49, 0.0  ;;  %v855_v56 = vadd.f32 %v1427_v18, %v1788_v20  ;;  %v1888_v21 = vsel %vm918_vm10, %v884_v0, 0.0 }
 0x1ff   : > { %v945_v59 = vadd.f32 %v944_v51, %v1850_v46  ;;  %v983_v61 = vadd.f32 %v982_v50, %v968_v52  ;;  %v846_v62 = vpop.f32.mrf.mxu1  ;;  %v973_v39 = vmul.f32 %v1888_v21, %v1888_v21 }
 0x200   : > { %v1873_v1 = vsel %vm916_vm9, %v882_v55, 0.0  ;;  %v847_v2 = vadd.f32 %v1788_v20, %v846_v62  ;;  %v885_v8 = vmax.f32 %v855_v56, 0.0 }
 0x201   : > { %v984_v4 = vadd.f32 %v983_v61, %v969_v58  ;;  %v946_v6 = vadd.f32 %v945_v59, %v1862_v54  ;;  %v1430_v7 = vpop.f32.mrf.mxu1  ;;  %v971_v14 = vmul.f32 %v1873_v1, %v1873_v1 }
 0x202   : > { %v883_v9 = vmax.f32 %v847_v2, 0.0  ;;  %v868_v28 = vadd.f32 %v1430_v7, %v1788_v20  ;;  %v1900_v35 = vsel %vm919_vm12, %v885_v8, 0.0 }
 0x203   : > { %v947_v13 = vadd.f32 %v946_v6, %v1873_v1  ;;  %v985_v15 = vadd.f32 %v984_v4, %v970_v3  ;;  %v859_v19 = vpop.f32.mrf.mxu1  ;;  %v974_v26 = vmul.f32 %v1900_v35, %v1900_v35 }
 0x204   : > { %v1890_v25 = vsel %vm917_vm11, %v883_v9, 0.0  ;;  %v860_v32 = vadd.f32 %v1788_v20, %v859_v19  ;;  %v888_v44 = vmax.f32 %v868_v28, 0.0 }
 0x205   : > { %v986_v34 = vadd.f32 %v985_v15, %v971_v14  ;;  %v948_v30 = vadd.f32 %v947_v13, %v1890_v25  ;;  %v972_v31 = vmul.f32 %v1890_v25, %v1890_v25  ;;  %v1431_v33 = vpop.f32.mrf.mxu1  ;;  %v961_v13 = vstv %s495_s12 }
 0x206   : > { %v886_v36 = vmax.f32 %v860_v32, 0.0  ;;  %v871_v38 = vadd.f32 %v1431_v33, %v1788_v20  ;;  %v938_v52 = vsel %vm922_vm14, %v888_v44, 0.0 }
 0x207   : > { %v949_v40 = vadd.f32 %v948_v30, %v1888_v21  ;;  %v987_v41 = vadd.f32 %v986_v34, %v972_v31  ;;  %v862_v43 = vpop.f32.mrf.mxu1  ;;  %v977_v57 = vmul.f32 %v938_v52, %v938_v52 }
 0x208   : > { %v1910_v23 = vsel %vm920_vm13, %v886_v36, 0.0  ;;  %v863_v24 = vadd.f32 %v1788_v20, %v862_v43  ;;  %v889_v48 = vmax.f32 %v871_v38, 0.0 }
 0x209   : > { %v988_v22 = vadd.f32 %v987_v41, %v973_v39  ;;  %v950_v45 = vadd.f32 %v949_v40, %v1900_v35  ;;  %v975_v50 = vmul.f32 %v1910_v23, %v1910_v23 }
 0x20a   : > { %v887_v53 = vmax.f32 %v863_v24, 0.0  ;;  %v939_v56 = vsel %vm923_vm0, %v889_v48, 0.0 }
 0x20b   : > { %v951_v49 = vadd.f32 %v950_v45, %v1910_v23  ;;  %v989_v51 = vadd.f32 %v988_v22, %v974_v26  ;;  %v978_v61 = vmul.f32 %v939_v56, %v939_v56 }
 0x20c   : > { %v937_v20 = vsel %vm921_vm15, %v887_v53, 0.0 }
 0x20d   : > { %v990_v18 = vadd.f32 %v989_v51, %v975_v50  ;;  %v952_v16 = vadd.f32 %v951_v49, %v937_v20  ;;  %v976_v55 = vmul.f32 %v937_v20, %v937_v20 }
 0x20f   : > { %v953_v58 = vadd.f32 %v952_v16, %v938_v52  ;;  %v991_v59 = vadd.f32 %v990_v18, %v976_v55 }
 0x211   : > { %v954_v62 = vadd.f32 %v953_v58, %v939_v56  ;;  %v992_v63 = vadd.f32 %v991_v59, %v977_v57 }
 0x213   : > { %v955_v0 = vrot.slane %v954_v62, 4  ;;  %v993_v2 = vadd.f32 %v992_v63, %v978_v61 }
 0x215   : > { %v956_v3 = vadd.f32 %v955_v0, %v954_v62  ;;  %v994_v4 = vrot.slane %v993_v2, 4 }
 0x217   : > { %v957_v6 = vrot.slane %v956_v3, 2  ;;  %v995_v7 = vadd.f32 %v994_v4, %v993_v2 }
 0x219   : > { %v958_v60 = vadd.f32 %v957_v6, %v956_v3  ;;  %v996_v8 = vrot.slane %v995_v7, 2 }
 0x21b   : > { %v959_v9 = vrot.slane %v958_v60, 1  ;;  %v997_v12 = vadd.f32 %v996_v8, %v995_v7 }
 0x21d   : > { %v960_v14 = vadd.f32 %v959_v9, %v958_v60  ;;  %v998_v15 = vrot.slane %v997_v12, 1 }
 0x21f   : > { %v1921_v19 = vmul.f32 %v961_v13, %v960_v14  ;;  %v999_v28 = vadd.f32 %v998_v15, %v997_v12 }
 0x221   : > { %v1000_v32 = vmul.f32 %v999_v28, %v961_v13  ;;  %v1001_v34 = vmul.f32 %v1921_v19, %v1921_v19  ;;  %v1017_v29 = vsub.f32 %v937_v20, %v1921_v19  ;;  %v1018_v36 = vsub.f32 %v938_v52, %v1921_v19 }
 0x222   : > { %v1019_v38 = vsub.f32 %v939_v56, %v1921_v19  ;;  %v1016_v39 = vsub.f32 %v1910_v23, %v1921_v19  ;;  %v1014_v40 = vsub.f32 %v1888_v21, %v1921_v19  ;;  %v1015_v41 = vsub.f32 %v1900_v35, %v1921_v19  ;;  %v1949_v21 = vld [vmem:[%s443_s18] ss:$0 sm:$0xff] }
 0x223   : > { %v1002_v30 = vsub.f32 %v1000_v32, %v1001_v34  ;;  %v1012_v42 = vsub.f32 %v1873_v1, %v1921_v19  ;;  %v1013_v43 = vsub.f32 %v1890_v25, %v1921_v19  ;;  %v1010_v44 = vsub.f32 %v1850_v46, %v1921_v19 }
 0x224   : > { %v1011_v24 = vsub.f32 %v1862_v54, %v1921_v19  ;;  %v1008_v1 = vsub.f32 %v1835_v37, %v1921_v19  ;;  %v1009_v25 = vsub.f32 %v1852_v47, %v1921_v19  ;;  %v1006_v46 = vsub.f32 %v1811_v10, %v1921_v19  ;;  %v1968_v37 = vld [vmem:[%s446_s1] ss:$0 sm:$0xff] }
 0x225   : > { %v1003_v31 = vmax.f32 %v1002_v30, 0.0  ;;  %v1007_v54 = vsub.f32 %v1824_v27, %v1921_v19  ;;  %v1004_v4 = vsub.f32 %v1806_v5, %v1921_v19  ;;  %v1005_v60 = vsub.f32 %v1813_v11, %v1921_v19 }
 0x227   : > { %v1020_v33 = vadd.f32 1e-05, %v1003_v31 }
 0x229   : > { %1489 = vrsqrt.f32 %v1020_v33 }
 0x236   : > { %v1942_v23 = vpop.eup %1489 }
 0x237   : > { %v1035_v35 = vmul.f32 %v1942_v23, %v1017_v29  ;;  %v1036_v26 = vmul.f32 %v1942_v23, %v1018_v36  ;;  %v1037_v22 = vmul.f32 %v1942_v23, %v1019_v38  ;;  %v1034_v45 = vmul.f32 %v1942_v23, %v1016_v39 }
 0x238   : > { %v1032_v47 = vmul.f32 %v1942_v23, %v1014_v40  ;;  %v1033_v10 = vmul.f32 %v1942_v23, %v1015_v41  ;;  %v1030_v27 = vmul.f32 %v1942_v23, %v1012_v42  ;;  %v1031_v48 = vmul.f32 %v1942_v23, %v1013_v43 }
 0x239   : > { %v1058_v53 = vmul.f32 %v1949_v21, %v1035_v35  ;;  %v1059_v49 = vmul.f32 %v1949_v21, %v1036_v26  ;;  %v1060_v50 = vmul.f32 %v1949_v21, %v1037_v22  ;;  %v1057_v51 = vmul.f32 %v1949_v21, %v1034_v45 }
 0x23a   : > { %v1055_v52 = vmul.f32 %v1949_v21, %v1032_v47  ;;  %v1056_v20 = vmul.f32 %v1949_v21, %v1033_v10  ;;  %v1053_v18 = vmul.f32 %v1949_v21, %v1030_v27  ;;  %v1054_v16 = vmul.f32 %v1949_v21, %v1031_v48 }
 0x23b   : > { %v1081_v55 = vadd.f32 %v1968_v37, %v1058_v53  ;;  %v1082_v56 = vadd.f32 %v1968_v37, %v1059_v49  ;;  %v1083_v57 = vadd.f32 %v1968_v37, %v1060_v50  ;;  %v1080_v58 = vadd.f32 %v1968_v37, %v1057_v51 }
 0x23c   : > { %v1987_v59 = vadd.f32 %v1968_v37, %v1055_v52  ;;  %v1990_v61 = vadd.f32 %v1968_v37, %v1056_v20  ;;  %v1993_v62 = vadd.f32 %v1968_v37, %v1053_v18  ;;  %v1996_v63 = vadd.f32 %v1968_v37, %v1054_v16 }
 0x23d   : > { %1097 = vst [vmem:[#allocation2 + $0x70] sm:$0xff] %v1081_v55  ;;  %1113 = vst [vmem:[%s1642_s25 + $0x68] sm:$0xff] %v1081_v55  ;;  %v1124_v0 = vpack.c.bf16 %v1083_v57, %v1082_v56  ;;  %v1028_v2 = vmul.f32 %v1942_v23, %v1010_v44  ;;  %v1029_v3 = vmul.f32 %v1942_v23, %v1011_v24 }
 0x23e   : > { %1098 = vst [vmem:[#allocation2 + $0x78] sm:$0xff] %v1082_v56  ;;  %1099 = vst [vmem:[#allocation2 + $0x28] sm:$0xff] %v1083_v57  ;;  %v1123_v6 = vpack.c.bf16 %v1081_v55, %v1080_v58  ;;  %v1026_v7 = vmul.f32 %v1942_v23, %v1008_v1  ;;  %v1027_v5 = vmul.f32 %v1942_v23, %v1009_v25  ;;  %v1116_v1 = vld [vmem:[%s2073_s5] sm:$0xf] }
 0x23f   : > { %1114 = vst [vmem:[%s1642_s25 + $0x70] sm:$0xff] %v1082_v56  ;;  %1115 = vst [vmem:[%s1642_s25 + $0x78] sm:$0xff] %v1083_v57  ;;  %1433 = vmatpush3.bf16.msra.mxu0 %v1124_v0  ;;  %v1051_v8 = vmul.f32 %v1949_v21, %v1028_v2  ;;  %v1052_v9 = vmul.f32 %v1949_v21, %v1029_v3  ;;  %v1024_v12 = vmul.f32 %v1942_v23, %v1006_v46 }
 0x240   : > { %1096 = vst [vmem:[#allocation2 + $0x60] sm:$0xff] %v1080_v58  ;;  %1112 = vst [vmem:[%s1642_s25 + $0x60] sm:$0xff] %v1080_v58  ;;  %v1025_v13 = vmul.f32 %v1942_v23, %v1007_v54  ;;  %1434 = vmatprep.subr.bf16.mxu0 %v1519_v17  ;;  %v1049_v14 = vmul.f32 %v1949_v21, %v1026_v7  ;;  %v1050_v15 = vmul.f32 %v1949_v21, %v1027_v5 }
 0x241   : > { %1094 = vst [vmem:[#allocation2 + $0x10] sm:$0xff] %v1987_v59  ;;  %1095 = vst [vmem:[#allocation2 + $0x38] sm:$0xff] %v1990_v61  ;;  %v1022_v28 = vmul.f32 %v1942_v23, %v1004_v4  ;;  %v1023_v11 = vmul.f32 %v1942_v23, %v1005_v60  ;;  %v1074_v19 = vadd.f32 %v1968_v37, %v1051_v8 }
 0x242   : > { %1110 = vst [vmem:[%s1642_s25 + $0x50] sm:$0xff] %v1987_v59  ;;  %1111 = vst [vmem:[%s1642_s25 + $0x58] sm:$0xff] %v1990_v61  ;;  %v1075_v32 = vadd.f32 %v1968_v37, %v1052_v9  ;;  %v1047_v34 = vmul.f32 %v1949_v21, %v1024_v12  ;;  %v1048_v30 = vmul.f32 %v1949_v21, %v1025_v13 }
 0x243   : > { %1092 = vst [vmem:[#allocation2 + $0x40] sm:$0xff] %v1993_v62  ;;  %1093 = vst [vmem:[#allocation2 + $0x20] sm:$0xff] %v1996_v63  ;;  %v1072_v31 = vadd.f32 %v1968_v37, %v1049_v14  ;;  %v1073_v33 = vadd.f32 %v1968_v37, %v1050_v15  ;;  %v1045_v29 = vmul.f32 %v1949_v21, %v1022_v28  ;;  %1435 = vmatpush3.bf16.msra.mxu0 %v1123_v6 }
 0x244   : > { %1108 = vst [vmem:[%s1642_s25 + $0x40] sm:$0xff] %v1993_v62  ;;  %1109 = vst [vmem:[%s1642_s25 + $0x48] sm:$0xff] %v1996_v63  ;;  %v1046_v36 = vmul.f32 %v1949_v21, %v1023_v11  ;;  %v1070_v38 = vadd.f32 %v1968_v37, %v1047_v34  ;;  %v1071_v39 = vadd.f32 %v1968_v37, %v1048_v30  ;;  %1436 = vmatprep.subr.bf16.mxu0 %v1519_v17 }
 0x245   : > { %1090 = vst [vmem:[#allocation2 + $0x8] sm:$0xff] %v1074_v19  ;;  %1091 = vst [vmem:[#allocation2 + $0x48] sm:$0xff] %v1075_v32  ;;  %v1068_v40 = vadd.f32 %v1968_v37, %v1045_v29  ;;  %v1122_v42 = vpack.c.bf16 %v1990_v61, %v1987_v59  ;;  %v1121_v24 = vpack.c.bf16 %v1996_v63, %v1993_v62 }
 0x246   : > { %1106 = vst [vmem:[%s1642_s25 + $0x30] sm:$0xff] %v1074_v19  ;;  %1107 = vst [vmem:[%s1642_s25 + $0x38] sm:$0xff] %v1075_v32  ;;  %v1069_v41 = vadd.f32 %v1968_v37, %v1046_v36  ;;  %v1118_v43 = vpack.c.bf16 %v1071_v39, %v1070_v38  ;;  %v1120_v23 = vpack.c.bf16 %v1075_v32, %v1074_v19 }
 0x247   : > { %1088 = vst [vmem:[#allocation2 + $0x50] sm:$0xff] %v1072_v31  ;;  %1089 = vst [vmem:[#allocation2 + $0x68] sm:$0xff] %v1073_v33  ;;  %1437 = vmatpush3.bf16.msra.mxu0 %v1122_v42  ;;  %v1119_v21 = vpack.c.bf16 %v1073_v33, %v1072_v31 }
 0x248   : > { %1104 = vst [vmem:[%s1642_s25 + $0x20] sm:$0xff] %v1072_v31  ;;  %1105 = vst [vmem:[%s1642_s25 + $0x28] sm:$0xff] %v1073_v33  ;;  %v1117_v44 = vpack.c.bf16 %v1069_v41, %v1068_v40  ;;  %1438 = vmatprep.subr.bf16.mxu0 %v1519_v17 }
 0x249   : > { %1086 = vst [vmem:[#allocation2 + $0x58] sm:$0xff] %v1070_v38  ;;  %1087 = vst [vmem:[#allocation2 + $0x18] sm:$0xff] %v1071_v39 }
 0x24a   : > { %1102 = vst [vmem:[%s1642_s25 + $0x10] sm:$0xff] %v1070_v38  ;;  %1103 = vst [vmem:[%s1642_s25 + $0x18] sm:$0xff] %v1071_v39 }
 0x24b   : > { %1084 = vst [vmem:[#allocation2 + $0x30] sm:$0xff] %v1068_v40  ;;  %1085 = vst [vmem:[#allocation2] sm:$0xff] %v1069_v41  ;;  %1439 = vmatpush3.bf16.msra.mxu0 %v1121_v24 }
 0x24c   : > { %1100 = vst [vmem:[%s1642_s25] sm:$0xff] %v1068_v40  ;;  %1101 = vst [vmem:[%s1642_s25 + $0x8] sm:$0xff] %v1069_v41  ;;  %1440 = vmatprep.subr.bf16.mxu0 %v1519_v17 }
 0x24f   : > { %1441 = vmatpush3.bf16.msra.mxu0 %v1120_v23 }
 0x250   : > { %1442 = vmatprep.subr.bf16.mxu0 %v1519_v17 }
 0x253   : > { %1443 = vmatpush3.bf16.msra.mxu0 %v1119_v21 }
 0x254   : > { %1444 = vmatprep.subr.bf16.mxu0 %v1519_v17 }
 0x257   : > { %1445 = vmatpush3.bf16.msra.mxu0 %v1118_v43 }
 0x258   : > { %1446 = vmatprep.subr.bf16.mxu0 %v1519_v17 }
 0x25b   : > { %1447 = vmatpush3.bf16.msra.mxu0 %v1117_v44 }
 0x25e   : > { %1449 = vmatmul.mubr.bf16.vlgmr.msra.gmra.mxu0 %v1116_v1 }
 0x31e   : > { %v1159_v25 = vpop.f32.mrf.mxu0 }
 0x31f   : > { %1165 = vst [vmem:[%s1648_s28] sm:$0xff] %v1159_v25 }
 0x320   : > { %v1450_v46 = vpop.f32.mrf.mxu0 }
 0x322   : > { %v1162_v54 = vpop.f32.mrf.mxu0 }
 0x324   : > { %v1451_v35 = vpop.f32.mrf.mxu0 }
 0x325 PF: > { %s25_s21 = sadd.s32 1, %s1516_s21  }
 0x326   : > { %p22_p2 = scmp.ge.s32.totalorder %s25_s21, 4  }
 0x328   :  { %24 = sbr.rel (!%p22_p2) target bundleno = 4 (0x4), region = 120 }
 0x32d   :  { %1201 = vsyncpa [#allocation6], 1 }
 0x32e   :  { %1203 = vsyncpa [#allocation6 + $0x1], 1 }

</bundles_post_ra>
